<compile_context>
chip_gen: v5e
topology: v5e:2x2
jax: 0.10.0
libtpu: 0.0.40
codegen_flags: <defaults>
</compile_context>

<pallas_src>
import functools

import numpy as np
import jax
import jax.numpy as jnp
from jax.experimental import pallas as pl
from jax.experimental.pallas import tpu as pltpu


_TARGET_STEP_BYTES = 2 * 1024 * 1024        # HBM bytes per input per grid step
_CHUNKED_MIN_SAMPLE_BYTES = 256 * 1024      # below this, batch-tile instead
_VMEM_LIMIT_BYTES = 32 * 1024 * 1024


def _round_up(x, m):
    return ((x + m - 1) // m) * m


# ---------------------------------------------------------------------------
# Path A: large, 128-aligned samples.  grid = (B, n_split, chunks_per_split)
# ---------------------------------------------------------------------------
def _ae_chunk_kernel(pred_ref, target_ref, part_ref, acc_ref, *,
                     r_total, r_tile, chunks_per_split, need_mask_branch):
    h = pl.program_id(1)            # parallel split of the reduction axis
    k = pl.program_id(2)            # chunk within this split

    @pl.when(k == 0)
    def _init():
        acc_ref[...] = jnp.zeros_like(acc_ref)

    # Intended (unclamped) global row offset of this chunk.  The index_map
    # clamps the DMA so it stays in bounds; the mask below zeroes overflow.
    row0 = (h * chunks_per_split + k) * r_tile

    def _accumulate(masked):
        d = jnp.abs(pred_ref[...].astype(jnp.float32)
                    - target_ref[...].astype(jnp.float32))        # (r_tile, 128)
        if masked:
            row = jax.lax.broadcasted_iota(jnp.int32, (r_tile, 128), 0) + row0
            # Select (NOT multiply) so NaN/Inf garbage in the padded region
            # cannot propagate into the sum.
            d = jnp.where(row < r_total, d, 0.0)
        # Fold r_tile rows into the (8, 128) accumulator with pure VPU adds.
        acc_ref[...] += d.reshape(r_tile // 8, 8, 128).sum(axis=0)

    if need_mask_branch:
        is_tail = row0 + r_tile > r_total

        @pl.when(jnp.logical_not(is_tail))
        def _fast():
            _accumulate(False)

        @pl.when(is_tail)
        def _tail():
            _accumulate(True)
    else:
        _accumulate(False)

    @pl.when(k == pl.num_programs(2) - 1)
    def _finalize():
        part_ref[0] = jnp.sum(acc_ref[...])


def _ae_loss_chunked(p3, t3):
    """p3, t3: (B, R, 128) views of the flattened samples."""
    B, R, _ = p3.shape
    itemsize = jnp.dtype(p3.dtype).itemsize

    # ~2 MiB of HBM per input per grid step; rows kept a multiple of 8 so the
    # (8, 128) accumulator fold is a pure-VPU reshape-reduce.
    r_target = max(8, (_TARGET_STEP_BYTES // (128 * itemsize)) // 8 * 8)
    r_tile = min(r_target, _round_up(R, 8))
    num_chunks = pl.cdiv(R, r_tile)

    # Give v7x's second TensorCore work when the batch axis alone cannot
    # (B odd / B == 1).  Harmless (size-1 axis) otherwise.
    n_split = 2 if (num_chunks >= 2 and B % 2 == 1) else 1
    cps = pl.cdiv(num_chunks, n_split)          # chunks per split
    # Static: does any chunk cover rows >= R (tail padding or overflow)?
    need_mask = (n_split * cps * r_tile) != R

    def in_map(b, h, k):
        c = h * cps + k
        return (b, jnp.minimum(c, num_chunks - 1), 0)

    kernel = functools.partial(
        _ae_chunk_kernel, r_total=R, r_tile=r_tile,
        chunks_per_split=cps, need_mask_branch=need_mask)

    cost = pl.CostEstimate(
        flops=3 * B * R * 128,                  # sub + abs + add per element
        transcendentals=0,
        bytes_accessed=2 * B * R * 128 * itemsize + B * n_split * 4)

    partials = pl.pallas_call(
        kernel,
        out_shape=jax.ShapeDtypeStruct((B * n_split,), jnp.float32),
        grid=(B, n_split, cps),
        in_specs=[
            pl.BlockSpec((None, r_tile, 128), in_map),
            pl.BlockSpec((None, r_tile, 128), in_map),
        ],
        out_specs=pl.BlockSpec((1,), lambda b, h, k: (b * n_split + h,),
                               memory_space=pltpu.SMEM),
        scratch_shapes=[pltpu.VMEM((8, 128), jnp.float32)],
        compiler_params=pltpu.CompilerParams(
            dimension_semantics=("parallel", "parallel", "arbitrary"),
            vmem_limit_bytes=_VMEM_LIMIT_BYTES),
        cost_estimate=cost,
    )(p3, t3)
    return partials.reshape(B, n_split).sum(axis=1)


# ---------------------------------------------------------------------------
# Path B: small samples (or N % 128 != 0), batch-tiled.  grid = (B / b_tile,)
# ---------------------------------------------------------------------------
def _ae_flat_kernel(pred_ref, target_ref, out_ref):
    # One grid step reduces a whole (b_tile, N) slab of samples.  The reduce
    # honors the logical extent N, so unaligned last dims need no padding.
    d = jnp.abs(pred_ref[...].astype(jnp.float32)
                - target_ref[...].astype(jnp.float32))
    out_ref[...] = jnp.sum(d, axis=1, keepdims=True)


def _ae_loss_flat(p2, t2):
    B, N = p2.shape
    itemsize = jnp.dtype(p2.dtype).itemsize

    bt = max(1, _TARGET_STEP_BYTES // max(1, N * itemsize))
    if bt >= B:
        b_tile = B                               # whole batch in one step
    else:
        # sample payload <= _CHUNKED_MIN_SAMPLE_BYTES here, so bt >= 8 and we
        # can honor the sublane constraint (multiple of 8, or full extent).
        b_tile = max(8, (bt // 8) * 8)
    num_blocks = pl.cdiv(B, b_tile)

    cost = pl.CostEstimate(
        flops=3 * B * N,
        transcendentals=0,
        bytes_accessed=2 * B * N * itemsize + B * 4)

    out = pl.pallas_call(
        _ae_flat_kernel,
        out_shape=jax.ShapeDtypeStruct((B, 1), jnp.float32),
        grid=(num_blocks,),
        in_specs=[
            pl.BlockSpec((b_tile, N), lambda i: (i, 0)),
            pl.BlockSpec((b_tile, N), lambda i: (i, 0)),
        ],
        out_specs=pl.BlockSpec((b_tile, 1), lambda i: (i, 0)),
        compiler_params=pltpu.CompilerParams(
            dimension_semantics=("parallel",),
            vmem_limit_bytes=_VMEM_LIMIT_BYTES),
        cost_estimate=cost,
    )(p2, t2)
    return out[:, 0]


# ---------------------------------------------------------------------------
# Public entry point (Pallas equivalent of AELoss.forward)
# ---------------------------------------------------------------------------
def ae_loss(pred, target):
    """Returns a (B,) float32 array: out[b] = sum(|pred[b] - target[b]|)."""
    assert pred.shape == target.shape, "pred/target shapes must match"
    B = pred.shape[0]
    N = int(np.prod(pred.shape[1:])) if pred.ndim > 1 else 1
    itemsize = jnp.dtype(pred.dtype).itemsize
    sample_bytes = N * itemsize

    p = pred.reshape(B, N)       # pure view (row-major), no HBM copy
    t = target.reshape(B, N)

    if sample_bytes >= _CHUNKED_MIN_SAMPLE_BYTES:
        if N % 128 == 0:
            R = N // 128
            return _ae_loss_chunked(p.reshape(B, R, 128), t.reshape(B, R, 128))
        # TODO(synk): rare corner (large sample AND N % 128 != 0) still takes
        # one pad copy; a copy-free variant needs element-granular blocks.
        pad = -N % 128
        p = jnp.pad(p, ((0, 0), (0, pad)))
        t = jnp.pad(t, ((0, 0), (0, pad)))
        R = p.shape[1] // 128
        return _ae_loss_chunked(p.reshape(B, R, 128), t.reshape(B, R, 128))

    return _ae_loss_flat(p, t)


if __name__ == "__main__":
    key = jax.random.PRNGKey(0)

    # 1) Module-scale demo shapes (small-N regime -> flat batch-tiled path).
    k1, k2 = jax.random.split(key)
    B, C, H, W = 2, 4, 16, 16
    pred = jax.random.normal(k1, (B, C, H, W), dtype=jnp.float32)
    target = jax.random.normal(k2, (B, C, H, W), dtype=jnp.float32)
    out = jax.block_until_ready(ae_loss(pred, target))
    ref = jnp.sum(jnp.abs(pred - target), axis=(1, 2, 3))
    np.testing.assert_allclose(np.asarray(out), np.asarray(ref),
                               rtol=1e-4, atol=1e-2)
    # Match PyTorch's list-of-scalars container with a single host transfer.
    ae_list = list(np.asarray(out))
    assert len(ae_list) == B

    # 2) Large aligned samples, even batch -> chunked path (single chunk).
    k3, k4 = jax.random.split(k1)
    pred2 = jax.random.normal(k3, (2, 8, 128, 128), dtype=jnp.float32)
    target2 = jax.random.normal(k4, (2, 8, 128, 128), dtype=jnp.float32)
    out2 = jax.block_until_ready(ae_loss(pred2, target2))
    ref2 = jnp.sum(jnp.abs(pred2 - target2), axis=(1, 2, 3))
    np.testing.assert_allclose(np.asarray(out2), np.asarray(ref2),
                               rtol=1e-4, atol=1e-2)

    # 3) Odd batch, multiple chunks -> exercises the 2-way megacore split,
    #    index clamping and the tail-mask branch.
    k5, k6 = jax.random.split(k3)
    pred3 = jax.random.normal(k5, (1, 1, 640, 1024), dtype=jnp.float32)
    target3 = jax.random.normal(k6, (1, 1, 640, 1024), dtype=jnp.float32)
    out3 = jax.block_until_ready(ae_loss(pred3, target3))
    ref3 = jnp.sum(jnp.abs(pred3 - target3), axis=(1, 2, 3))
    np.testing.assert_allclose(np.asarray(out3), np.asarray(ref3),
                               rtol=1e-4, atol=1e-2)

    # 4) N % 128 != 0 -> flat path, copy-free logical-extent reduce (no pad).
    k7, k8 = jax.random.split(k5)
    pred4 = jax.random.normal(k7, (3, 3, 5, 7), dtype=jnp.float32)
    target4 = jax.random.normal(k8, (3, 3, 5, 7), dtype=jnp.float32)
    out4 = jax.block_until_ready(ae_loss(pred4, target4))
    ref4 = jnp.sum(jnp.abs(pred4 - target4), axis=(1, 2, 3))
    np.testing.assert_allclose(np.asarray(out4), np.asarray(ref4),
                               rtol=1e-4, atol=1e-2)

    print("KERNEL_OK")
</pallas_src>

<mosaic_0001>
module attributes {stable_mosaic.version = 11 : i64} {
  func.func @_ae_flat_kernel(%arg0: i32, %arg1: memref<2x1024xf32, #tpu.memory_space<vmem>>, %arg2: memref<2x1024xf32, #tpu.memory_space<vmem>>, %arg3: memref<2x1xf32, #tpu.memory_space<vmem>>) attributes {dimension_semantics = [#tpu.dimension_semantics<parallel>], iteration_bounds = array<i64: 1>, scalar_prefetch = 0 : i64, scratch_operands = 0 : i64, tpu.core_type = #tpu.core_type<tc>, window_params = [{transform_indices = @transform_0, window_bounds = array<i64: 2, 1024>}, {transform_indices = @transform_1, window_bounds = array<i64: 2, 1024>}, {transform_indices = @transform_2, window_bounds = array<i64: 2, 1>}]} {
    %c0 = arith.constant 0 : index
    %c0_0 = arith.constant 0 : index
    %0 = vector.load %arg1[%c0, %c0_0] : memref<2x1024xf32, #tpu.memory_space<vmem>>, vector<2x1024xf32>
    %c0_1 = arith.constant 0 : index
    %c0_2 = arith.constant 0 : index
    %1 = vector.load %arg2[%c0_1, %c0_2] : memref<2x1024xf32, #tpu.memory_space<vmem>>, vector<2x1024xf32>
    %2 = arith.subf %0, %1 : vector<2x1024xf32>
    %3 = math.absf %2 : vector<2x1024xf32>
    %cst = arith.constant dense<0.000000e+00> : vector<2xf32>
    %4 = vector.multi_reduction <add>, %3, %cst [1] : vector<2x1024xf32> to vector<2xf32>
    %5 = vector.shape_cast %4 : vector<2xf32> to vector<2x1xf32>
    %c0_3 = arith.constant 0 : index
    %c0_4 = arith.constant 0 : index
    %6 = vector.load %arg3[%c0_3, %c0_4] : memref<2x1xf32, #tpu.memory_space<vmem>>, vector<2x1xf32>
    tpu.vector_store %arg3[%c0_3, %c0_4], %5 {strides = array<i32>} : memref<2x1xf32, #tpu.memory_space<vmem>>, vector<2x1xf32>,
    return
  }
  func.func @transform_0(%arg0: i32) -> (i32, i32) {
    %c0_i32 = arith.constant 0 : i32
    %c0_i32_0 = arith.constant 0 : i32
    return %arg0, %c0_i32 : i32, i32
  }
  func.func @transform_1(%arg0: i32) -> (i32, i32) {
    %c0_i32 = arith.constant 0 : i32
    %c0_i32_0 = arith.constant 0 : i32
    return %arg0, %c0_i32 : i32, i32
  }
  func.func @transform_2(%arg0: i32) -> (i32, i32) {
    %c0_i32 = arith.constant 0 : i32
    %c0_i32_0 = arith.constant 0 : i32
    return %arg0, %c0_i32 : i32, i32
  }
}

</mosaic_0001>

<bundles_post_ra>
// kernel: tpu_custom_call.1
= control target key start
LH: loop header
LB: loop body
LE: loop exit
PB: predicated region body
PF: predicated region fallthrough
CT: control target
= control target key end

     0   :  { %7 = vsyncpa [#allocation3], 0  ;;  %s182_s0 = inlined_call_operand.hbm [shape: f32[2,1024], index: 0, kind: input, shape index: {}]   ;;  %s183_s1 = inlined_call_operand.hbm [shape: f32[2,1024], index: 1, kind: input, shape index: {}]   ;;  %s184_s2 = inlined_call_operand.vmem [shape: f32[2,1], index: 2, kind: output, shape index: {}]  }
   0x1   :  { %s14_s11 = sshll.u32 %s182_s0, 4  ;;  %s15_s11 = int_to_ptr.hbm [resolvable:$true] %s14_s11 }
   0x2   :  { %8 = vsyncpa [#allocation5], 0  ;;  %s148_s12 = smov [#allocation2]   ;;  %s25_s16 = sshll.u32 %s183_s1, 4  ;;  %s26_s16 = int_to_ptr.hbm [resolvable:$true] %s25_s16 }
   0x3   :  { %s16_s13 = sshll.u32 %s148_s12, 4  ;;  %s149_s17 = smov [#allocation4]   ;;  %s17_s13 = int_to_ptr.vmem [resolvable:$true] %s16_s13 }
   0x4   :  { %19 = dma.hbm_to_vmem [thread:$0]  %s15_s11, 256, %s17_s13, [#allocation3]  }
   0x5   :  { %s27_s18 = sshll.u32 %s149_s17, 4  ;;  %s28_s18 = int_to_ptr.vmem [resolvable:$true] %s27_s18 }
   0x6   :  { %30 = dma.hbm_to_vmem [thread:$0]  %s26_s16, 256, %s28_s18, [#allocation5]  }
   0x7   :  { %144 = dma.done.wait [#allocation3], 256  }
   0x8   :  { %145 = vsyncadd [#allocation3], 4294967040 }
   0x9   :  { %146 = dma.done.wait [#allocation5], 256  }
   0xa   :  { %147 = vsyncadd [#allocation5], 4294967040  ;;  %v39_v0 = vld [vmem:[#allocation2] sm:$0xff]  ;;  %v40_v1 = vld [vmem:[#allocation2 + $0x8] sm:$0xff]  ;;  %vm68_vm0 = vcmask 1041408   ;;  %vm86_vm1 = vcmask 1024  }
   0xb   :  { %v41_v2 = vld [vmem:[#allocation4] sm:$0xff]  ;;  %v42_v3 = vld [vmem:[#allocation4 + $0x8] sm:$0xff] }
   0xc   :  { %v43_v4 = vsub.f32 %v39_v0, %v41_v2  ;;  %v44_v5 = vsub.f32 %v40_v1, %v42_v3 }
   0xe   :  { %v45_v6 = vand.u32 2147483647, %v43_v4  ;;  %v46_v7 = vand.u32 2147483647, %v44_v5 }
  0x10   :  { %49 = vst [vmem:[#allocation1] ss:$4 sm:$0xff] %v45_v6 }
  0x11   :  { %51 = vst [vmem:[#allocation1 + $0x20] ss:$4 sm:$0xff] %v46_v7 }
  0x17   :  { %v52_v8 = vld.sshfl [vmem:[#allocation1] sm:$0xff pattern:$0x73625140]  ;;  %v53_v9 = vld.sshfl [vmem:[#allocation1 + $0x8] sm:$0xff pattern:$0x73625140] }
  0x18   :  { %v54_v10 = vld.sshfl [vmem:[#allocation1 + $0x10] sm:$0xff pattern:$0x73625140]  ;;  %v55_v11 = vld.sshfl [vmem:[#allocation1 + $0x18] sm:$0xff pattern:$0x73625140] }
  0x19   :  { %v69_v12 = vsel %vm68_vm0, %v52_v8, 0.0  ;;  %v70_v13 = vsel %vm68_vm0, %v53_v9, 0.0  ;;  %v72_v14 = vsel %vm68_vm0, %v54_v10, 0.0  ;;  %v56_v15 = vld.sshfl [vmem:[#allocation1 + $0x20] sm:$0xff pattern:$0x73625140] }
  0x1a   :  { %v71_v16 = vadd.f32 %v70_v13, %v69_v12  ;;  %v74_v17 = vsel %vm68_vm0, %v55_v11, 0.0  ;;  %v57_v18 = vld.sshfl [vmem:[#allocation1 + $0x28] sm:$0xff pattern:$0x73625140]  ;;  %v76_v20 = vsel %vm68_vm0, %v56_v15, 0.0 }
  0x1b   :  { %v58_v21 = vld.sshfl [vmem:[#allocation1 + $0x30] sm:$0xff pattern:$0x73625140]  ;;  %v78_v23 = vsel %vm68_vm0, %v57_v18, 0.0 }
  0x1c   :  { %v73_v19 = vadd.f32 %v72_v14, %v71_v16  ;;  %v59_v24 = vld.sshfl [vmem:[#allocation1 + $0x38] sm:$0xff pattern:$0x73625140]  ;;  %v80_v26 = vsel %vm68_vm0, %v58_v21, 0.0 }
  0x1d   :  { %v82_v28 = vsel %vm68_vm0, %v59_v24, 0.0 }
  0x1e   :  { %v75_v22 = vadd.f32 %v74_v17, %v73_v19 }
  0x20   :  { %v77_v25 = vadd.f32 %v76_v20, %v75_v22 }
  0x22   :  { %v79_v27 = vadd.f32 %v78_v23, %v77_v25 }
  0x24   :  { %v81_v29 = vadd.f32 %v80_v26, %v79_v27 }
  0x26   :  { %v83_v30 = vadd.f32 %v82_v28, %v81_v29 }
  0x28   :  { %84 = vadd.xlane.f32.xlu0 %v83_v30 }
  0x9b   :  { %v85_v31 = vpop.xlane.xlu0 %84 }
  0x9c   :  { %87 = vst.msk [vmem:[%s184_s2] sm:$0x3] %vm86_vm1, %v85_v31 }
  0x9d   :  { %92 = vsyncpa [#allocation3], 1 }
  0x9e   :  { %93 = vsyncpa [#allocation5], 1 }

</bundles_post_ra>
